<compile_context>
chip_gen: v5e
topology: v5e:2x2
jax: 0.10.0
libtpu: 0.0.40
codegen_flags: <defaults>
</compile_context>

<pallas_src>
import numpy as np
import jax
import jax.numpy as jnp
from jax.experimental import pallas as pl
from jax.experimental.pallas import tpu as pltpu


def _h_tanh_kernel(params_ref, x_ref, o_ref):
    """params_ref (SMEM, f32[2]) = [h_max/3, h_max]; elementwise VPU pass."""
    scale = params_ref[0]
    offset = params_ref[1]
    x = x_ref[...].astype(jnp.float32)           # f32 math (v5e has no bf16 VALU)
    y = jnp.clip(x + 3.0, 0.0, 6.0) * scale - offset
    o_ref[...] = y.astype(o_ref.dtype)           # store back in the I/O dtype


def _num_tensorcores():
    """Best-effort TensorCores-per-device (2 on v7x/megacore, else 1)."""
    try:
        info = pltpu.get_tpu_info()
        for attr in ("num_cores", "core_count", "tensorcores_per_chip",
                     "num_tensorcores", "cores_per_chip"):
            v = getattr(info, attr, None)
            if isinstance(v, int) and v > 0:
                return min(v, 2)
    except Exception:
        pass
    try:
        v = getattr(jax.devices()[0], "num_cores", None)
        if isinstance(v, int) and v > 0:
            return min(v, 2)
    except Exception:
        pass
    return 1


def _sublane_tile(dtype):
    itemsize = jnp.dtype(dtype).itemsize
    return {4: 8, 2: 16, 1: 32}.get(itemsize, 8)


def h_tanh_pallas(x, h_max=1.0, *, max_block_bytes=2 << 20):
    """Elementwise h_tanh for any shape / dtype via one lane-dense Pallas pass."""
    orig_shape = x.shape
    dtype = x.dtype
    flat = x.reshape(-1)
    n = flat.shape[0]

    # ---- lane-dense 2D view, with NO padding whenever numel % 128 == 0 ------
    lane = None
    for cand in (512, 256, 128):
        if n >= cand and n % cand == 0:
            lane = cand
            break

    padded = False
    if lane is None:
        # Ragged size: pad only up to the next multiple of 128 (the one extra
        # HBM pass is confined to genuinely unaligned shapes).
        lane = 128
        padded_n = pl.cdiv(n, lane) * lane
        flat = jnp.pad(flat, (0, padded_n - n))
        padded = True

    rows = flat.shape[0] // lane
    x2 = flat.reshape(rows, lane)

    # ---- block_rows / grid selection ----------------------------------------
    itemsize = jnp.dtype(dtype).itemsize
    sub = _sublane_tile(dtype)                       # 8 f32 / 16 bf16 / 32 int8
    n_cores = _num_tensorcores()

    # Cap block bytes so 4 x block_bytes (in+out, double buffered) stays well
    # under the 16 MiB default scoped VMEM on v5e and 64 MiB physical on v7x.
    block_cap = max(sub, (max_block_bytes // (lane * itemsize)) // sub * sub)

    if rows <= block_cap and (n_cores <= 1 or rows < 2 * sub):
        # Single full-extent block: biggest contiguous DMA, no split overhead.
        block_rows = rows
    else:
        num_blocks = pl.cdiv(rows, block_cap)
        if n_cores > 1:
            # Keep the block count a multiple of the core count so no
            # TensorCore idles with an odd leftover block.
            num_blocks = pl.cdiv(num_blocks, n_cores) * n_cores
        block_rows = pl.cdiv(rows, num_blocks)
        block_rows = pl.cdiv(block_rows, sub) * sub  # packed-sublane aligned
        if block_rows >= rows:
            block_rows = rows
    num_blocks = pl.cdiv(rows, block_rows)

    # ---- scalar params in SMEM (no recompile per h_max, traced h_max OK) ----
    hm = jnp.asarray(h_max, jnp.float32).reshape(())
    params = jnp.stack([hm / 3.0, hm])               # f32[2] = [scale, offset]

    out2 = pl.pallas_call(
        _h_tanh_kernel,
        out_shape=jax.ShapeDtypeStruct((rows, lane), dtype),
        grid=(num_blocks,),
        in_specs=[
            pl.BlockSpec(memory_space=pltpu.MemorySpace.SMEM),
            pl.BlockSpec((block_rows, lane), lambda i: (i, 0)),
        ],
        out_specs=pl.BlockSpec((block_rows, lane), lambda i: (i, 0)),
        compiler_params=pltpu.CompilerParams(
            dimension_semantics=("parallel",)),
    )(params, x2)

    out = out2.reshape(-1)
    if padded:
        out = out[:n]
    return out.reshape(orig_shape)


# ---------------------------------------------------------------------------
# Pure-JAX reference (direct transcription of the torch forward)
# ---------------------------------------------------------------------------
def h_tanh_ref(x, h_max=1.0):
    return jnp.clip(x + 3.0, 0.0, 6.0) * h_max / 3.0 - h_max


if __name__ == "__main__":
    key = jax.random.PRNGKey(0)

    # Activation-sized input consistent with a conv net: (B, C, H, W).
    x = jax.random.normal(key, (2, 4, 16, 16), jnp.float32) * 3.0
    out = jax.block_until_ready(h_tanh_pallas(x, 1.0))
    ref = h_tanh_ref(x, 1.0)
    np.testing.assert_allclose(np.asarray(out), np.asarray(ref),
                               rtol=1e-5, atol=1e-5)

    # Medium, 128-aligned f32 case (exercises multi-block / parallel grid)
    # with a non-default h_max.
    x_big = jax.random.normal(jax.random.PRNGKey(2), (4, 8, 32, 32), jnp.float32) * 3.0
    out_big = jax.block_until_ready(h_tanh_pallas(x_big, h_max=3.0))
    ref_big = h_tanh_ref(x_big, h_max=3.0)
    np.testing.assert_allclose(np.asarray(out_big), np.asarray(ref_big),
                               rtol=1e-5, atol=1e-5)

    # Ragged, non-(8,128)-aligned size with bf16 I/O (exercises the pad path).
    x_odd = jax.random.normal(jax.random.PRNGKey(1), (3, 5, 14, 9), jnp.bfloat16) * 3.0
    out_odd = jax.block_until_ready(h_tanh_pallas(x_odd, h_max=2.0))
    ref_odd = h_tanh_ref(x_odd.astype(jnp.float32), h_max=2.0).astype(jnp.bfloat16)
    np.testing.assert_allclose(np.asarray(out_odd, dtype=np.float32),
                               np.asarray(ref_odd, dtype=np.float32),
                               rtol=1e-2, atol=1e-2)

    print("KERNEL_OK")
</pallas_src>

<mosaic_0001>
module attributes {stable_mosaic.version = 11 : i64} {
  func.func @_h_tanh_kernel(%arg0: i32, %arg1: memref<2xf32, #tpu.memory_space<smem>>, %arg2: memref<4x512xf32, #tpu.memory_space<vmem>>, %arg3: memref<4x512xf32, #tpu.memory_space<vmem>>) attributes {dimension_semantics = [#tpu.dimension_semantics<parallel>], iteration_bounds = array<i64: 1>, scalar_prefetch = 0 : i64, scratch_operands = 0 : i64, tpu.core_type = #tpu.core_type<tc>, window_params = [{transform_indices = @transform_0, window_bounds = array<i64: 2>}, {transform_indices = @transform_1, window_bounds = array<i64: 4, 512>}, {transform_indices = @transform_2, window_bounds = array<i64: 4, 512>}]} {
    %c0 = arith.constant 0 : index
    %0 = memref.load %arg1[%c0] : memref<2xf32, #tpu.memory_space<smem>>
    %c1 = arith.constant 1 : index
    %1 = memref.load %arg1[%c1] : memref<2xf32, #tpu.memory_space<smem>>
    %c0_0 = arith.constant 0 : index
    %c0_1 = arith.constant 0 : index
    %2 = vector.load %arg2[%c0_0, %c0_1] : memref<4x512xf32, #tpu.memory_space<vmem>>, vector<4x512xf32>
    %cst = arith.constant 3.000000e+00 : f32
    %3 = vector.broadcast %cst : f32 to vector<4x512xf32>
    %4 = arith.addf %2, %3 : vector<4x512xf32>
    %cst_2 = arith.constant 0.000000e+00 : f32
    %cst_3 = arith.constant 6.000000e+00 : f32
    %5 = vector.broadcast %cst_2 : f32 to vector<4x512xf32>
    %6 = arith.maximumf %5, %4 : vector<4x512xf32>
    %7 = vector.broadcast %cst_3 : f32 to vector<4x512xf32>
    %8 = arith.minimumf %7, %6 : vector<4x512xf32>
    %9 = vector.broadcast %0 : f32 to vector<4x512xf32>
    %10 = arith.mulf %8, %9 : vector<4x512xf32>
    %11 = vector.broadcast %1 : f32 to vector<4x512xf32>
    %12 = arith.subf %10, %11 : vector<4x512xf32>
    %c0_4 = arith.constant 0 : index
    %c0_5 = arith.constant 0 : index
    %13 = vector.load %arg3[%c0_4, %c0_5] : memref<4x512xf32, #tpu.memory_space<vmem>>, vector<4x512xf32>
    tpu.vector_store %arg3[%c0_4, %c0_5], %12 {strides = array<i32>} : memref<4x512xf32, #tpu.memory_space<vmem>>, vector<4x512xf32>,
    return
  }
  func.func @transform_0(%arg0: i32) -> i32 {
    %c0_i32 = arith.constant 0 : i32
    %c0_i32_0 = arith.constant 0 : i32
    return %c0_i32 : i32
  }
  func.func @transform_1(%arg0: i32) -> (i32, i32) {
    %c0_i32 = arith.constant 0 : i32
    %c0_i32_0 = arith.constant 0 : i32
    return %arg0, %c0_i32 : i32, i32
  }
  func.func @transform_2(%arg0: i32) -> (i32, i32) {
    %c0_i32 = arith.constant 0 : i32
    %c0_i32_0 = arith.constant 0 : i32
    return %arg0, %c0_i32 : i32, i32
  }
}

</mosaic_0001>

<bundles_post_ra>
// kernel: tpu_custom_call.1
= control target key start
LH: loop header
LB: loop body
LE: loop exit
PB: predicated region body
PF: predicated region fallthrough
CT: control target
= control target key end

     0   :  { %7 = vsyncpa [#allocation5], 0  ;;  %s172_s0 = inlined_call_operand.hbm [shape: f32[2], index: 0, kind: input, shape index: {}]   ;;  %s173_s1 = inlined_call_operand.hbm [shape: f32[4,512], index: 1, kind: input, shape index: {}]   ;;  %s174_s2 = inlined_call_operand.hbm [shape: f32[4,512], index: 2, kind: output, shape index: {}]  }
   0x1   :  { %8 = vsyncpa [#allocation3], 0 }
   0x2   :  { %9 = vsyncpa [#allocation4], 0  ;;  %s15_s11 = sshll.u32 %s172_s0, 4  ;;  %s24_s14 = sshll.u32 %s173_s1, 4  ;;  %s16_s11 = int_to_ptr.hbm [resolvable:$true] %s15_s11  ;;  %s25_s14 = int_to_ptr.hbm [resolvable:$true] %s24_s14 }
   0x3   :  { %s145_s15 = smov [#allocation2]   ;;  %s146_s16 = smov [#allocation6]  }
   0x4   :  { %18 = dma.hbm_to_smem %s16_s11, 16, %s145_s15, [#allocation5]  }
   0x5   :  { %s26_s17 = sshll.u32 %s146_s16, 4  ;;  %s27_s17 = int_to_ptr.vmem [resolvable:$true] %s26_s17 }
   0x6   :  { %29 = dma.hbm_to_vmem [thread:$0]  %s25_s14, 256, %s27_s17, [#allocation3]  }
   0x7   :  { %139 = dma.done.wait [#allocation5], 16  }
   0x8   :  { %140 = vsyncadd [#allocation5], 4294967280 }
   0x9   :  { %141 = dma.done.wait [#allocation3], 256  }
   0xa   :  { %142 = vsyncadd [#allocation3], 4294967040 }
   0xb   :  { %38 = sfence }
   0xc   :  { %s39_s18 = sld [smem:[#allocation2]]  ;;  %v41_v0 = vld [vmem:[#allocation6] sm:$0xff]  ;;  %v42_v1 = vld [vmem:[#allocation6 + $0x8] sm:$0xff]  ;;  %s147_s1 = smov [#allocation7]  }
   0xd   :  { %s75_s0 = sld [smem:[#allocation2 + $0x1]]  ;;  %v43_v2 = vadd.f32 3.0, %v41_v0  ;;  %v44_v3 = vadd.f32 3.0, %v42_v1  ;;  %s62_s19 = sshll.u32 %s147_s1, 4  ;;  %s63_s19 = int_to_ptr.vmem [resolvable:$true] %s62_s19 }
   0xe   :  { %s64_s22 = sshll.u32 %s174_s2, 4  ;;  %s65_s22 = int_to_ptr.hbm [resolvable:$true] %s64_s22 }
   0xf   :  { %v45_v4 = vmax.f32 %v43_v2, 0.0  ;;  %v46_v5 = vmax.f32 %v44_v3, 0.0 }
  0x11   :  { %v47_v6 = vmin.f32 %v45_v4, 6.0  ;;  %v48_v7 = vmin.f32 %v46_v5, 6.0 }
  0x12   :  { %v49_v8 = vstv %s39_s18 }
  0x13   :  { %v50_v9 = vmul.f32 %v49_v8, %v47_v6  ;;  %v52_v10 = vstv %s75_s0  ;;  %v51_v11 = vmul.f32 %v49_v8, %v48_v7 }
  0x15   :  { %v53_v12 = vsub.f32 %v50_v9, %v52_v10  ;;  %v54_v13 = vsub.f32 %v51_v11, %v52_v10 }
  0x17   :  { %55 = vst [vmem:[#allocation7] sm:$0xff] %v53_v12 }
  0x18   :  { %56 = vst [vmem:[#allocation7 + $0x8] sm:$0xff] %v54_v13 }
  0x19   :  { %67 = dma.vmem_to_hbm [thread:$0]  %s63_s19, 256, %s65_s22, [#allocation4]  }
  0x1a   :  { %143 = dma.done.wait [#allocation4], 256  }
  0x1b   :  { %144 = vsyncadd [#allocation4], 4294967040 }
  0x1c   :  { %72 = vsyncpa [#allocation3], 1 }
  0x1d   :  { %73 = vsyncpa [#allocation4], 1 }
  0x1e   :  { %74 = vsyncpa [#allocation5], 1 }

</bundles_post_ra>
